<compile_context>
chip_gen: v7x
topology: tpu7x:2x2x1
jax: 0.10.0
libtpu: 0.0.40
codegen_flags: <defaults>
</compile_context>

<pallas_src>
import functools

import jax
import jax.numpy as jnp
from jax.experimental import pallas as pl
from jax.experimental.pallas import tpu as pltpu

LANE = 128            # lane-pad width for every channel-like dimension
SUBLANE = 8
NEG_INF = -1e30

VMEM_SPEC = pl.BlockSpec(memory_space=pltpu.MemorySpace.VMEM)


def _round_up(v, m):
    return ((v + m - 1) // m) * m


# ----------------------------------------------------------------------------
# Fused Pallas kernel: conv layers + global_max_pool + MLP head.
# ----------------------------------------------------------------------------
def _fused_forward_kernel(a_ref, x_ref, pos_ref, dpos_ref,
                          wconv_ref, bconv_ref,
                          pbias_ref, gvalid_ref,
                          wlin_ref, blin_ref, wout_ref, bout_ref,
                          out_ref, *, num_conv_layers):
    a = a_ref[...]                    # [Np, Np]  row-normalized adjacency
    pos = pos_ref[...]                # [Np, 128] positions in lanes 0:2 (rest 0)

    # mean_{j in N(i)} (pos_j - pos_i); layer-independent -> computed once.
    agg_p = jnp.dot(a, pos, preferred_element_type=jnp.float32) - dpos_ref[...]

    h = x_ref[...]                    # [Np, 128] node features in lanes 0:F
    for l in range(num_conv_layers):  # static, unrolled
        agg_h = jnp.dot(a, h, preferred_element_type=jnp.float32)     # [Np, 128]
        comb = jnp.concatenate([agg_h, agg_p, h], axis=-1)            # [Np, 384]
        h = jnp.dot(comb, wconv_ref[l], preferred_element_type=jnp.float32)
        # ReLU after every conv (module's `index != num_conv_layers` is always
        # true); F.dropout(training=False) is an identity.
        h = jnp.maximum(h + bconv_ref[l], 0.0)

    # global_max_pool over `batch`: additive membership bias + max over nodes.
    biased = h[None, :, :] + pbias_ref[...]                 # [Gp, Np, 128]
    pooled = jnp.max(biased, axis=1) * gvalid_ref[...]      # [Gp, 128]

    hid = jnp.dot(pooled, wlin_ref[...], preferred_element_type=jnp.float32)
    hid = jnp.maximum(hid + blin_ref[...], 0.0)
    out_ref[...] = (jnp.dot(hid, wout_ref[...], preferred_element_type=jnp.float32)
                    + bout_ref[...])


# ----------------------------------------------------------------------------
# Wrapper: plain-JAX glue (padding / dense adjacency), one pallas_call.
# ----------------------------------------------------------------------------
def vector_sage_module_forward(packed, x, edge_index, batch, pos,
                               *, num_graphs, output_size):
    num_nodes, feat = x.shape
    n_pad = _round_up(max(num_nodes, SUBLANE), SUBLANE)
    g_pad = _round_up(max(num_graphs, SUBLANE), SUBLANE)
    num_conv_layers = packed["w_convs"].shape[0]

    # Dense row-normalized adjacency (mean aggregator); padded rows/cols stay 0.
    src, tgt = edge_index[0], edge_index[1]
    A = jnp.zeros((n_pad, n_pad), jnp.float32).at[tgt, src].add(1.0)
    deg = A.sum(axis=1, keepdims=True)
    A = A / jnp.maximum(deg, 1.0)
    deg_mask = (deg > 0).astype(jnp.float32)                          # [Np, 1]

    # Lane-pad node features and positions to 128 lanes.
    x_pad = jnp.zeros((n_pad, LANE), jnp.float32).at[:num_nodes, :feat].set(x)
    pos_pad = jnp.zeros((n_pad, LANE), jnp.float32).at[:num_nodes, :pos.shape[1]].set(pos)
    dpos = deg_mask * pos_pad        # subtract pos_i only where deg(i) > 0

    # Pool membership bias: 0 where node n belongs to graph g, -1e30 otherwise.
    batch_pad = jnp.full((n_pad,), -1, jnp.int32).at[:num_nodes].set(batch.astype(jnp.int32))
    member = batch_pad[None, :] == jnp.arange(g_pad, dtype=jnp.int32)[:, None]   # [Gp, Np]
    pool_bias = jnp.where(member, 0.0, NEG_INF).astype(jnp.float32)[:, :, None]  # [Gp, Np, 1]
    gvalid = (jnp.arange(g_pad) < num_graphs).astype(jnp.float32)[:, None]       # [Gp, 1]

    out_pad = pl.pallas_call(
        functools.partial(_fused_forward_kernel, num_conv_layers=num_conv_layers),
        out_shape=jax.ShapeDtypeStruct((g_pad, LANE), jnp.float32),
        in_specs=[VMEM_SPEC] * 12,
        out_specs=VMEM_SPEC,
    )(A, x_pad, pos_pad, dpos,
      packed["w_convs"], packed["b_convs"],
      pool_bias, gvalid,
      packed["w_lin"], packed["b_lin"], packed["w_out"], packed["b_out"])

    return out_pad[:num_graphs, :output_size]


# ----------------------------------------------------------------------------
# Deterministic parameter initialization + packing into MXU-friendly layout.
# ----------------------------------------------------------------------------
def init_params(hparams, key):
    def dense(key, fan_in, fan_out):
        kw, kb = jax.random.split(key)
        scale = 1.0 / jnp.sqrt(jnp.float32(fan_in))
        w = jax.random.uniform(kw, (fan_in, fan_out), jnp.float32, -scale, scale)
        b = jax.random.uniform(kb, (1, fan_out), jnp.float32, -scale, scale)
        return w, b

    spatial_dim = 2
    convs = []
    in_ch = hparams["num_node_features"]
    for _ in range(hparams["num_conv_layers"]):
        key, k1, k2 = jax.random.split(key, 3)
        wn, bn = dense(k1, in_ch + spatial_dim, hparams["conv_size"])   # combined [F+2, C]
        wr, br = dense(k2, in_ch, hparams["conv_size"])
        convs.append({"w_neigh": wn, "b_neigh": bn,
                      "w_root": wr, "b_root": br, "in_ch": in_ch})
        in_ch = hparams["conv_size"]

    key, k_lin, k_out = jax.random.split(key, 3)
    w_lin, b_lin = dense(k_lin, hparams["conv_size"], hparams["lin_size"])
    w_out, b_out = dense(k_out, hparams["lin_size"], hparams["output_size"])
    return {"convs": convs, "w_lin": w_lin, "b_lin": b_lin,
            "w_out": w_out, "b_out": b_out}


def pack_params(params, hparams):
    """Zero-pad every channel dim to LANE and stack the three per-layer weight
    matrices into a single [3*LANE, LANE] matmul operand per conv layer."""
    conv_size = hparams["conv_size"]
    w_convs, b_convs = [], []
    for lp in params["convs"]:
        in_ch = lp["in_ch"]
        wn, wr = lp["w_neigh"], lp["w_root"]
        w = jnp.zeros((3 * LANE, LANE), jnp.float32)
        w = w.at[:in_ch, :conv_size].set(wn[:in_ch])                 # neighbor-feature rows
        w = w.at[LANE:LANE + 2, :conv_size].set(wn[in_ch:])          # neighbor-position rows
        w = w.at[2 * LANE:2 * LANE + in_ch, :conv_size].set(wr)      # root rows
        b = jnp.zeros((1, LANE), jnp.float32).at[:, :conv_size].set(
            lp["b_neigh"] + lp["b_root"])
        w_convs.append(w)
        b_convs.append(b)

    lin_size = hparams["lin_size"]
    out_size = hparams["output_size"]
    w_lin = jnp.zeros((LANE, LANE), jnp.float32).at[:conv_size, :lin_size].set(params["w_lin"])
    b_lin = jnp.zeros((1, LANE), jnp.float32).at[:, :lin_size].set(params["b_lin"])
    w_out = jnp.zeros((LANE, LANE), jnp.float32).at[:lin_size, :out_size].set(params["w_out"])
    b_out = jnp.zeros((1, LANE), jnp.float32).at[:, :out_size].set(params["b_out"])
    return {"w_convs": jnp.stack(w_convs), "b_convs": jnp.stack(b_convs),
            "w_lin": w_lin, "b_lin": b_lin, "w_out": w_out, "b_out": b_out}


# ----------------------------------------------------------------------------
# Main
# ----------------------------------------------------------------------------
if __name__ == "__main__":
    hparams = {
        "num_node_features": 4,
        "conv_size": 32,
        "lin_size": 32,
        "output_size": 8,
        "num_conv_layers": 2,
    }

    key = jax.random.PRNGKey(0)
    key, k_param, k_x, k_pos = jax.random.split(key, 4)
    params = init_params(hparams, k_param)
    packed = pack_params(params, hparams)

    # Two graphs of 8 nodes each -> 16 nodes total.
    num_graphs = 2
    nodes_per_graph = 8
    num_nodes = num_graphs * nodes_per_graph

    x = jax.random.normal(k_x, (num_nodes, hparams["num_node_features"]), jnp.float32)
    pos = jax.random.normal(k_pos, (num_nodes, 2), jnp.float32)
    batch = jnp.repeat(jnp.arange(num_graphs, dtype=jnp.int32), nodes_per_graph)

    # Bidirectional ring edges within each graph.
    src_list, tgt_list = [], []
    for g in range(num_graphs):
        base = g * nodes_per_graph
        for i in range(nodes_per_graph):
            a = base + i
            b = base + (i + 1) % nodes_per_graph
            src_list += [a, b]
            tgt_list += [b, a]
    edge_index = jnp.array([src_list, tgt_list], dtype=jnp.int32)    # [2, E]

    fwd = jax.jit(functools.partial(vector_sage_module_forward,
                                    num_graphs=num_graphs,
                                    output_size=hparams["output_size"]))
    out = fwd(packed, x, edge_index, batch, pos)
    jax.block_until_ready(out)
    assert out.shape == (num_graphs, hparams["output_size"])
    assert bool(jnp.all(jnp.isfinite(out)))
    print("KERNEL_OK")
</pallas_src>

<mosaic_0001>
module attributes {stable_mosaic.version = 11 : i64} {
  func.func private @main(%arg0: i32) attributes {dimension_semantics = [#tpu.dimension_semantics<core_parallel>], iteration_bounds = array<i64: 2>, tpu.core_type = #tpu.core_type<sc_scalar_subcore>, window_params = []} {
    return
  }
}

module attributes {stable_mosaic.version = 11 : i64} {
  func.func private @main(%arg0: i32) attributes {dimension_semantics = [#tpu.dimension_semantics<core_parallel>], iteration_bounds = array<i64: 2>, tpu.core_type = #tpu.core_type<sc_scalar_subcore>, window_params = []} {
    return
  }
}

module attributes {stable_mosaic.version = 11 : i64} {
  func.func @_fused_forward_kernel(%arg0: memref<16x16xf32, #tpu.memory_space<vmem>>, %arg1: memref<16x128xf32, #tpu.memory_space<vmem>>, %arg2: memref<16x128xf32, #tpu.memory_space<vmem>>, %arg3: memref<16x128xf32, #tpu.memory_space<vmem>>, %arg4: memref<2x384x128xf32, #tpu.memory_space<vmem>>, %arg5: memref<2x1x128xf32, #tpu.memory_space<vmem>>, %arg6: memref<8x16x1xf32, #tpu.memory_space<vmem>>, %arg7: memref<8x1xf32, #tpu.memory_space<vmem>>, %arg8: memref<128x128xf32, #tpu.memory_space<vmem>>, %arg9: memref<1x128xf32, #tpu.memory_space<vmem>>, %arg10: memref<128x128xf32, #tpu.memory_space<vmem>>, %arg11: memref<1x128xf32, #tpu.memory_space<vmem>>, %arg12: memref<8x128xf32, #tpu.memory_space<vmem>>) attributes {dimension_semantics = [], scalar_prefetch = 0 : i64, scratch_operands = 0 : i64, tpu.core_type = #tpu.core_type<tc>} {
    %c0 = arith.constant 0 : index
    %c0_0 = arith.constant 0 : index
    %0 = vector.load %arg0[%c0, %c0_0] : memref<16x16xf32, #tpu.memory_space<vmem>>, vector<16x16xf32>
    %c0_1 = arith.constant 0 : index
    %c0_2 = arith.constant 0 : index
    %1 = vector.load %arg2[%c0_1, %c0_2] : memref<16x128xf32, #tpu.memory_space<vmem>>, vector<16x128xf32>
    %cst = arith.constant dense<0.000000e+00> : vector<16x128xf32>
    %2 = tpu.matmul %0, %1, %cst {dimension_numbers = #tpu.dot_dimension_numbers<[1], [0], [0], [1], [0, 0, 1, 1], [], []>} : vector<16x16xf32>, vector<16x128xf32>, vector<16x128xf32> -> vector<16x128xf32>
    %c0_3 = arith.constant 0 : index
    %c0_4 = arith.constant 0 : index
    %3 = vector.load %arg3[%c0_3, %c0_4] : memref<16x128xf32, #tpu.memory_space<vmem>>, vector<16x128xf32>
    %4 = arith.subf %2, %3 : vector<16x128xf32>
    %c0_5 = arith.constant 0 : index
    %c0_6 = arith.constant 0 : index
    %5 = vector.load %arg1[%c0_5, %c0_6] : memref<16x128xf32, #tpu.memory_space<vmem>>, vector<16x128xf32>
    %cst_7 = arith.constant dense<0.000000e+00> : vector<16x128xf32>
    %6 = tpu.matmul %0, %5, %cst_7 {dimension_numbers = #tpu.dot_dimension_numbers<[1], [0], [0], [1], [0, 0, 1, 1], [], []>} : vector<16x16xf32>, vector<16x128xf32>, vector<16x128xf32> -> vector<16x128xf32>
    %7 = tpu.concatenate %6, %4, %5 in 1 : vector<16x128xf32>, vector<16x128xf32>, vector<16x128xf32> -> vector<16x384xf32>
    %c0_8 = arith.constant 0 : index
    %c0_9 = arith.constant 0 : index
    %c0_10 = arith.constant 0 : index
    %8 = vector.load %arg4[%c0_8, %c0_9, %c0_10] : memref<2x384x128xf32, #tpu.memory_space<vmem>>, vector<1x384x128xf32>
    %9 = vector.shape_cast %8 : vector<1x384x128xf32> to vector<384x128xf32>
    %cst_11 = arith.constant dense<0.000000e+00> : vector<16x128xf32>
    %10 = tpu.matmul %7, %9, %cst_11 {dimension_numbers = #tpu.dot_dimension_numbers<[1], [0], [0], [1], [0, 0, 1, 1], [], []>} : vector<16x384xf32>, vector<384x128xf32>, vector<16x128xf32> -> vector<16x128xf32>
    %c0_12 = arith.constant 0 : index
    %c0_13 = arith.constant 0 : index
    %c0_14 = arith.constant 0 : index
    %11 = vector.load %arg5[%c0_12, %c0_13, %c0_14] : memref<2x1x128xf32, #tpu.memory_space<vmem>>, vector<1x1x128xf32>
    %12 = vector.shape_cast %11 : vector<1x1x128xf32> to vector<1x128xf32>
    %13 = vector.broadcast %12 : vector<1x128xf32> to vector<16x128xf32>
    %14 = arith.addf %10, %13 : vector<16x128xf32>
    %cst_15 = arith.constant 0.000000e+00 : f32
    %15 = vector.broadcast %cst_15 : f32 to vector<16x128xf32>
    %16 = arith.maximumf %14, %15 : vector<16x128xf32>
    %cst_16 = arith.constant dense<0.000000e+00> : vector<16x128xf32>
    %17 = tpu.matmul %0, %16, %cst_16 {dimension_numbers = #tpu.dot_dimension_numbers<[1], [0], [0], [1], [0, 0, 1, 1], [], []>} : vector<16x16xf32>, vector<16x128xf32>, vector<16x128xf32> -> vector<16x128xf32>
    %18 = tpu.concatenate %17, %4, %16 in 1 : vector<16x128xf32>, vector<16x128xf32>, vector<16x128xf32> -> vector<16x384xf32>
    %c1 = arith.constant 1 : index
    %c0_17 = arith.constant 0 : index
    %c0_18 = arith.constant 0 : index
    %19 = vector.load %arg4[%c1, %c0_17, %c0_18] : memref<2x384x128xf32, #tpu.memory_space<vmem>>, vector<1x384x128xf32>
    %20 = vector.shape_cast %19 : vector<1x384x128xf32> to vector<384x128xf32>
    %cst_19 = arith.constant dense<0.000000e+00> : vector<16x128xf32>
    %21 = tpu.matmul %18, %20, %cst_19 {dimension_numbers = #tpu.dot_dimension_numbers<[1], [0], [0], [1], [0, 0, 1, 1], [], []>} : vector<16x384xf32>, vector<384x128xf32>, vector<16x128xf32> -> vector<16x128xf32>
    %c1_20 = arith.constant 1 : index
    %c0_21 = arith.constant 0 : index
    %c0_22 = arith.constant 0 : index
    %22 = vector.load %arg5[%c1_20, %c0_21, %c0_22] : memref<2x1x128xf32, #tpu.memory_space<vmem>>, vector<1x1x128xf32>
    %23 = vector.shape_cast %22 : vector<1x1x128xf32> to vector<1x128xf32>
    %24 = vector.broadcast %23 : vector<1x128xf32> to vector<16x128xf32>
    %25 = arith.addf %21, %24 : vector<16x128xf32>
    %cst_23 = arith.constant 0.000000e+00 : f32
    %26 = vector.broadcast %cst_23 : f32 to vector<16x128xf32>
    %27 = arith.maximumf %25, %26 : vector<16x128xf32>
    %28 = vector.shape_cast %27 : vector<16x128xf32> to vector<1x16x128xf32>
    %c0_24 = arith.constant 0 : index
    %c0_25 = arith.constant 0 : index
    %c0_26 = arith.constant 0 : index
    %29 = vector.load %arg6[%c0_24, %c0_25, %c0_26] : memref<8x16x1xf32, #tpu.memory_space<vmem>>, vector<8x16x1xf32>
    %30 = vector.broadcast %28 : vector<1x16x128xf32> to vector<8x16x128xf32>
    %31 = vector.broadcast %29 : vector<8x16x1xf32> to vector<8x16x128xf32>
    %32 = arith.addf %30, %31 : vector<8x16x128xf32>
    %cst_27 = arith.constant dense<0xFF800000> : vector<8x128xf32>
    %33 = vector.multi_reduction <maximumf>, %32, %cst_27 [1] : vector<8x16x128xf32> to vector<8x128xf32>
    %c0_28 = arith.constant 0 : index
    %c0_29 = arith.constant 0 : index
    %34 = vector.load %arg7[%c0_28, %c0_29] : memref<8x1xf32, #tpu.memory_space<vmem>>, vector<8x1xf32>
    %35 = vector.broadcast %34 : vector<8x1xf32> to vector<8x128xf32>
    %36 = arith.mulf %33, %35 : vector<8x128xf32>
    %c0_30 = arith.constant 0 : index
    %c0_31 = arith.constant 0 : index
    %37 = vector.load %arg8[%c0_30, %c0_31] : memref<128x128xf32, #tpu.memory_space<vmem>>, vector<128x128xf32>
    %cst_32 = arith.constant dense<0.000000e+00> : vector<8x128xf32>
    %38 = tpu.matmul %36, %37, %cst_32 {dimension_numbers = #tpu.dot_dimension_numbers<[1], [0], [0], [1], [0, 0, 1, 1], [], []>} : vector<8x128xf32>, vector<128x128xf32>, vector<8x128xf32> -> vector<8x128xf32>
    %c0_33 = arith.constant 0 : index
    %c0_34 = arith.constant 0 : index
    %39 = vector.load %arg9[%c0_33, %c0_34] : memref<1x128xf32, #tpu.memory_space<vmem>>, vector<1x128xf32>
    %40 = vector.broadcast %39 : vector<1x128xf32> to vector<8x128xf32>
    %41 = arith.addf %38, %40 : vector<8x128xf32>
    %cst_35 = arith.constant 0.000000e+00 : f32
    %42 = vector.broadcast %cst_35 : f32 to vector<8x128xf32>
    %43 = arith.maximumf %41, %42 : vector<8x128xf32>
    %c0_36 = arith.constant 0 : index
    %c0_37 = arith.constant 0 : index
    %44 = vector.load %arg10[%c0_36, %c0_37] : memref<128x128xf32, #tpu.memory_space<vmem>>, vector<128x128xf32>
    %cst_38 = arith.constant dense<0.000000e+00> : vector<8x128xf32>
    %45 = tpu.matmul %43, %44, %cst_38 {dimension_numbers = #tpu.dot_dimension_numbers<[1], [0], [0], [1], [0, 0, 1, 1], [], []>} : vector<8x128xf32>, vector<128x128xf32>, vector<8x128xf32> -> vector<8x128xf32>
    %c0_39 = arith.constant 0 : index
    %c0_40 = arith.constant 0 : index
    %46 = vector.load %arg11[%c0_39, %c0_40] : memref<1x128xf32, #tpu.memory_space<vmem>>, vector<1x128xf32>
    %47 = vector.broadcast %46 : vector<1x128xf32> to vector<8x128xf32>
    %48 = arith.addf %45, %47 : vector<8x128xf32>
    %c0_41 = arith.constant 0 : index
    %c0_42 = arith.constant 0 : index
    %49 = vector.load %arg12[%c0_41, %c0_42] : memref<8x128xf32, #tpu.memory_space<vmem>>, vector<8x128xf32>
    tpu.vector_store %arg12[%c0_41, %c0_42], %48 {strides = array<i32>} : memref<8x128xf32, #tpu.memory_space<vmem>>, vector<8x128xf32>,
    return
  }
}

</mosaic_0001>

<bundles_post_ra>
// kernel: vector_sage_module_forward.1
= control target key start
LH: loop header
LB: loop body
LE: loop exit
PB: predicated region body
PF: predicated region fallthrough
CT: control target
= control target key end

     0   :  { %vm45_vm0 = vcmask 130048   ;;  %vm1691_vm1 = vmmov 0   ;;  %vm927_vm2 = vcmask 1041409   ;;  %vm930_vm3 = vcmask 1042434   ;;  %s2304_s2 = inlined_call_operand.vmem [shape: f32[16,128], index: 2, kind: input, shape index: {}]   ;;  %s2305_s1 = inlined_call_operand.vmem [shape: f32[16,128], index: 1, kind: input, shape index: {}]   ;;  %s2306_s0 = inlined_call_operand.vmem [shape: f32[16,16], index: 0, kind: input, shape index: {}]   ;;  %s2307_s4 = inlined_call_operand.vmem [shape: f32[2,384,128], index: 4, kind: input, shape index: {}]   ;;  %s2308_s3 = inlined_call_operand.vmem [shape: f32[16,128], index: 3, kind: input, shape index: {}]   ;;  %s2309_s5 = inlined_call_operand.vmem [shape: f32[2,1,128], index: 5, kind: input, shape index: {}]   ;;  %s2310_s6 = inlined_call_operand.vmem [shape: f32[8,16,1], index: 6, kind: input, shape index: {}]   ;;  %s2311_s7 = inlined_call_operand.vmem [shape: f32[8,1], index: 7, kind: input, shape index: {}]   ;;  %s2312_s8 = inlined_call_operand.vmem [shape: f32[128,128], index: 8, kind: input, shape index: {}]   ;;  %s2313_s10 = inlined_call_operand.vmem [shape: f32[128,128], index: 10, kind: input, shape index: {}]   ;;  %s2314_s9 = inlined_call_operand.vmem [shape: f32[1,128], index: 9, kind: input, shape index: {}]   ;;  %s2315_s11 = inlined_call_operand.vmem [shape: f32[1,128], index: 11, kind: input, shape index: {}]   ;;  %s2316_s12 = inlined_call_operand.vmem [shape: f32[8,128], index: 12, kind: output, shape index: {}]  }
   0x1   :  { %v43_v0 = vld [vmem:[%s2304_s2] sm:$0xff]  ;;  %v44_v1 = vld [vmem:[%s2304_s2 + $0x8] sm:$0xff]  ;;  %v226_v12 = vld [vmem:[%s2307_s4 + $0x90] sm:$0xff]  ;;  %vm933_vm4 = vcmask 1043459   ;;  %vm936_vm5 = vcmask 1044484   ;;  %vm939_vm6 = vcmask 1045509  }
   0x2   :  { %v131_v2 = vld [vmem:[%s2305_s1] sm:$0xff]  ;;  %v1495_v3 = vpack.c.bf16 %v44_v1, %v43_v0  ;;  %v1770_v4 = vld [vmem:[%s2305_s1 + $0x8] sm:$0xff]  ;;  %v227_v13 = vld [vmem:[%s2307_s4 + $0x98] sm:$0xff]  ;;  %vm942_vm7 = vcmask 1046534   ;;  %vm945_vm8 = vcmask 1047559  }
   0x3   :  { %v1775_v5 = vld [vmem:[%s2306_s0] sm:$0xff]  ;;  %v1499_v6 = vpack.c.bf16 %v1770_v4, %v131_v2  ;;  %v225_v8 = vld [vmem:[%s2307_s4 + $0x88] sm:$0xff]  ;;  %v1507_v18 = vpack.c.bf16 %v227_v13, %v226_v12  ;;  %v210_v20 = vld [vmem:[%s2307_s4 + $0x10] sm:$0xff] }
   0x4   :  { %1338 = vmatprep.mubr.msk.f32.mxu0 %vm45_vm0, %v1775_v5  ;;  %1345 = vmatprep.mubr.msk.f32.mxu1 %vm45_vm0, %v1775_v5  ;;  %v224_v7 = vld [vmem:[%s2307_s4 + $0x80] sm:$0xff]  ;;  %v209_v11 = vld [vmem:[%s2307_s4 + $0x8] sm:$0xff]  ;;  %v211_v21 = vld [vmem:[%s2307_s4 + $0x18] sm:$0xff] }
   0x5   :  { %v208_v9 = vld [vmem:[%s2307_s4] sm:$0xff]  ;;  %1496 = vmatprep.subr.bf16.mxu0 %v1495_v3  ;;  %v1503_v10 = vpack.c.bf16 %v225_v8, %v224_v7  ;;  %1500 = vmatprep.subr.bf16.mxu1 %v1499_v6  ;;  %v1803_v14 = vld [vmem:[%s2306_s0 + $0x8] sm:$0xff]  ;;  %v242_v24 = vld [vmem:[%s2307_s4 + $0x110] sm:$0xff]  ;;  %v1509_v27 = vpack.c.bf16 %v211_v21, %v210_v20 }
   0x6   :  { %1498 = vmatpush3.bf16.msra.mxu0 %v1495_v3  ;;  %v1505_v15 = vpack.c.bf16 %v209_v11, %v208_v9  ;;  %v240_v16 = vld [vmem:[%s2307_s4 + $0x100] sm:$0xff]  ;;  %v241_v17 = vld [vmem:[%s2307_s4 + $0x108] sm:$0xff]  ;;  %1502 = vmatpush3.bf16.msra.mxu1 %v1499_v6  ;;  %v243_v25 = vld [vmem:[%s2307_s4 + $0x118] sm:$0xff] }
   0x7   :  { %1504 = vmatprep.subr.bf16.mxu0 %v1503_v10  ;;  %v1535_v19 = vpack.c.bf16 %v241_v17, %v240_v16  ;;  %v228_v22 = vld [vmem:[%s2307_s4 + $0xa0] sm:$0xff]  ;;  %v229_v23 = vld [vmem:[%s2307_s4 + $0xa8] sm:$0xff]  ;;  %v1539_v26 = vpack.c.bf16 %v243_v25, %v242_v24  ;;  %v230_v33 = vld [vmem:[%s2307_s4 + $0xb0] sm:$0xff] }
   0x8   :  { %v244_v28 = vld [vmem:[%s2307_s4 + $0x120] sm:$0xff]  ;;  %v245_v29 = vld [vmem:[%s2307_s4 + $0x128] sm:$0xff]  ;;  %v1511_v30 = vpack.c.bf16 %v229_v23, %v228_v22  ;;  %v231_v34 = vld [vmem:[%s2307_s4 + $0xb8] sm:$0xff] }
   0x9   :  { %1339 = vmatmul.mubr.msk.f32.vlgmr.msra.gmra.mrb[0].mxu0 %vm45_vm0, %v1803_v14  ;;  %1536 = vmatprep.subr.bf16.mxu1 %v1535_v19  ;;  %v212_v31 = vld [vmem:[%s2307_s4 + $0x20] sm:$0xff]  ;;  %v213_v32 = vld [vmem:[%s2307_s4 + $0x28] sm:$0xff]  ;;  %v1543_v35 = vpack.c.bf16 %v245_v29, %v244_v28  ;;  %v246_v36 = vld [vmem:[%s2307_s4 + $0x130] sm:$0xff]  ;;  %v1515_v39 = vpack.c.bf16 %v231_v34, %v230_v33 }
   0xa   :  { %1346 = vmatmul.mubr.msk.f32.vlgmr.msra.gmra.mrb[0].mxu1 %vm45_vm0, %v1803_v14  ;;  %1506 = vmatpush3.bf16.msra.mxu0 %v1505_v15  ;;  %v247_v37 = vld [vmem:[%s2307_s4 + $0x138] sm:$0xff]  ;;  %v1513_v38 = vpack.c.bf16 %v213_v32, %v212_v31  ;;  %v214_v40 = vld [vmem:[%s2307_s4 + $0x30] sm:$0xff]  ;;  %v232_v42 = vld [vmem:[%s2307_s4 + $0xc0] sm:$0xff] }
   0xb   :  { %1508 = vmatprep.subr.bf16.mxu0 %v1507_v18  ;;  %1538 = vmatpush3.bf16.msra.mxu1 %v1535_v19  ;;  %v215_v41 = vld [vmem:[%s2307_s4 + $0x38] sm:$0xff]  ;;  %v233_v43 = vld [vmem:[%s2307_s4 + $0xc8] sm:$0xff]  ;;  %v1547_v44 = vpack.c.bf16 %v247_v37, %v246_v36  ;;  %v248_v45 = vld [vmem:[%s2307_s4 + $0x140] sm:$0xff] }
   0xc   :  { %1540 = vmatprep.subr.bf16.mxu1 %v1539_v26  ;;  %1380 = vmatprep.mubr.f32.mxu1 %v131_v2  ;;  %v249_v46 = vld [vmem:[%s2307_s4 + $0x148] sm:$0xff]  ;;  %v1517_v47 = vpack.c.bf16 %v215_v41, %v214_v40  ;;  %v1519_v48 = vpack.c.bf16 %v233_v43, %v232_v42  ;;  %v216_v49 = vld [vmem:[%s2307_s4 + $0x40] sm:$0xff]  ;;  %v234_v51 = vld [vmem:[%s2307_s4 + $0xd0] sm:$0xff] }
   0xd   :  { %v217_v50 = vld [vmem:[%s2307_s4 + $0x48] sm:$0xff]  ;;  %v235_v52 = vld [vmem:[%s2307_s4 + $0xd8] sm:$0xff]  ;;  %v1551_v53 = vpack.c.bf16 %v249_v46, %v248_v45  ;;  %v250_v54 = vld [vmem:[%s2307_s4 + $0x150] sm:$0xff] }
   0xe   :  { %1510 = vmatpush3.bf16.msra.mxu0 %v1509_v27  ;;  %v251_v55 = vld [vmem:[%s2307_s4 + $0x158] sm:$0xff]  ;;  %v1521_v56 = vpack.c.bf16 %v217_v50, %v216_v49  ;;  %v1523_v57 = vpack.c.bf16 %v235_v52, %v234_v51  ;;  %v218_v58 = vld [vmem:[%s2307_s4 + $0x50] sm:$0xff]  ;;  %v236_v60 = vld [vmem:[%s2307_s4 + $0xe0] sm:$0xff] }
   0xf   :  { %1512 = vmatprep.subr.bf16.mxu0 %v1511_v30  ;;  %1542 = vmatpush3.bf16.msra.mxu1 %v1539_v26  ;;  %v219_v59 = vld [vmem:[%s2307_s4 + $0x58] sm:$0xff]  ;;  %v237_v61 = vld [vmem:[%s2307_s4 + $0xe8] sm:$0xff]  ;;  %v1555_v62 = vpack.c.bf16 %v251_v55, %v250_v54  ;;  %v220_v1 = vld [vmem:[%s2307_s4 + $0x60] sm:$0xff] }
  0x10   :  { %1544 = vmatprep.subr.bf16.mxu1 %v1543_v35  ;;  %v1525_v63 = vpack.c.bf16 %v219_v59, %v218_v58  ;;  %v1527_v0 = vpack.c.bf16 %v237_v61, %v236_v60  ;;  %v221_v2 = vld [vmem:[%s2307_s4 + $0x68] sm:$0xff]  ;;  %v238_v6 = vld [vmem:[%s2307_s4 + $0xf0] sm:$0xff]  ;;  %v239_v7 = vld [vmem:[%s2307_s4 + $0xf8] sm:$0xff] }
  0x11   :  { %v1529_v3 = vpack.c.bf16 %v221_v2, %v220_v1  ;;  %v252_v8 = vld [vmem:[%s2307_s4 + $0x160] sm:$0xff]  ;;  %v1531_v9 = vpack.c.bf16 %v239_v7, %v238_v6  ;;  %v253_v10 = vld [vmem:[%s2307_s4 + $0x168] sm:$0xff]  ;;  %v222_v11 = vld [vmem:[%s2307_s4 + $0x70] sm:$0xff] }
  0x12   :  { %1514 = vmatpush3.bf16.msra.mxu0 %v1513_v38  ;;  %v223_v12 = vld [vmem:[%s2307_s4 + $0x78] sm:$0xff]  ;;  %v1559_v13 = vpack.c.bf16 %v253_v10, %v252_v8  ;;  %v254_v16 = vld [vmem:[%s2307_s4 + $0x170] sm:$0xff]  ;;  %v127_v19 = vld [vmem:[%s2308_s3] sm:$0xff] }
  0x13   :  { %1516 = vmatprep.subr.bf16.mxu0 %v1515_v39  ;;  %1546 = vmatpush3.bf16.msra.mxu1 %v1543_v35  ;;  %v1533_v15 = vpack.c.bf16 %v223_v12, %v222_v11  ;;  %v255_v17 = vld [vmem:[%s2307_s4 + $0x178] sm:$0xff]  ;;  %v128_v21 = vld [vmem:[%s2308_s3 + $0x8] sm:$0xff]  ;;  %v1140_v27 = vld [vmem:[%s2307_s4 + $0x200] sm:$0xff] }
  0x14   :  { %1548 = vmatprep.subr.bf16.mxu1 %v1547_v44  ;;  %v1563_v18 = vpack.c.bf16 %v255_v17, %v254_v16  ;;  %v1141_v28 = vld [vmem:[%s2307_s4 + $0x208] sm:$0xff]  ;;  %v1124_v29 = vld [vmem:[%s2307_s4 + $0x180] sm:$0xff]  ;;  %v1142_v32 = vld [vmem:[%s2307_s4 + $0x210] sm:$0xff] }
  0x15   :  { %v1571_v30 = vpack.c.bf16 %v1141_v28, %v1140_v27  ;;  %v1125_v31 = vld [vmem:[%s2307_s4 + $0x188] sm:$0xff]  ;;  %v1143_v33 = vld [vmem:[%s2307_s4 + $0x218] sm:$0xff]  ;;  %v1126_v36 = vld [vmem:[%s2307_s4 + $0x190] sm:$0xff] }
  0x16   :  { %1518 = vmatpush3.bf16.msra.mxu0 %v1517_v47  ;;  %v1573_v34 = vpack.c.bf16 %v1125_v31, %v1124_v29  ;;  %v1575_v35 = vpack.c.bf16 %v1143_v33, %v1142_v32  ;;  %v1127_v37 = vld [vmem:[%s2307_s4 + $0x198] sm:$0xff]  ;;  %v1144_v38 = vld [vmem:[%s2307_s4 + $0x220] sm:$0xff]  ;;  %v1145_v39 = vld [vmem:[%s2307_s4 + $0x228] sm:$0xff] }
  0x17   :  { %1520 = vmatprep.subr.bf16.mxu0 %v1519_v48  ;;  %1550 = vmatpush3.bf16.msra.mxu1 %v1547_v44  ;;  %v1577_v40 = vpack.c.bf16 %v1127_v37, %v1126_v36  ;;  %v1579_v41 = vpack.c.bf16 %v1145_v39, %v1144_v38  ;;  %v1128_v42 = vld [vmem:[%s2307_s4 + $0x1a0] sm:$0xff]  ;;  %v1129_v43 = vld [vmem:[%s2307_s4 + $0x1a8] sm:$0xff]  ;;  %v1146_v44 = vld [vmem:[%s2307_s4 + $0x230] sm:$0xff] }
  0x18   :  { %1552 = vmatprep.subr.bf16.mxu1 %v1551_v53  ;;  %v1147_v45 = vld [vmem:[%s2307_s4 + $0x238] sm:$0xff]  ;;  %v1581_v46 = vpack.c.bf16 %v1129_v43, %v1128_v42  ;;  %v1130_v48 = vld [vmem:[%s2307_s4 + $0x1b0] sm:$0xff]  ;;  %v1148_v50 = vld [vmem:[%s2307_s4 + $0x240] sm:$0xff] }
  0x19   :  { %v1583_v47 = vpack.c.bf16 %v1147_v45, %v1146_v44  ;;  %v1131_v49 = vld [vmem:[%s2307_s4 + $0x1b8] sm:$0xff]  ;;  %v1149_v51 = vld [vmem:[%s2307_s4 + $0x248] sm:$0xff]  ;;  %v1132_v54 = vld [vmem:[%s2307_s4 + $0x1c0] sm:$0xff] }
  0x1a   :  { %1522 = vmatpush3.bf16.msra.mxu0 %v1521_v56  ;;  %v1585_v52 = vpack.c.bf16 %v1131_v49, %v1130_v48  ;;  %v1133_v55 = vld [vmem:[%s2307_s4 + $0x1c8] sm:$0xff]  ;;  %v1150_v56 = vld [vmem:[%s2307_s4 + $0x250] sm:$0xff]  ;;  %v1135_v61 = vld [vmem:[%s2307_s4 + $0x1d8] sm:$0xff] }
  0x1b   :  { %1524 = vmatprep.subr.bf16.mxu0 %v1523_v57  ;;  %1554 = vmatpush3.bf16.msra.mxu1 %v1551_v53  ;;  %v1587_v53 = vpack.c.bf16 %v1149_v51, %v1148_v50  ;;  %v1151_v57 = vld [vmem:[%s2307_s4 + $0x258] sm:$0xff]  ;;  %v1589_v58 = vpack.c.bf16 %v1133_v55, %v1132_v54  ;;  %v1134_v60 = vld [vmem:[%s2307_s4 + $0x1d0] sm:$0xff]  ;;  %v1136_v2 = vld [vmem:[%s2307_s4 + $0x1e0] sm:$0xff]  ;;  %v1689_v50 = vmov 0  }
  0x1c   :  { %1556 = vmatprep.subr.bf16.mxu1 %v1555_v62  ;;  %v1591_v59 = vpack.c.bf16 %v1151_v57, %v1150_v56  ;;  %v1154_v6 = vld [vmem:[%s2307_s4 + $0x270] sm:$0xff]  ;;  %v1155_v7 = vld [vmem:[%s2307_s4 + $0x278] sm:$0xff]  ;;  %v1121_v16 = vld [vmem:[%s2309_s5] ss:$0 sm:$0xff]  ;;  %1687 = vset.pattern.permute.xlu0 %v1689_v50 }
  0x1d   :  { %v1138_v10 = vld [vmem:[%s2307_s4 + $0x1f0] sm:$0xff]  ;;  %v1139_v11 = vld [vmem:[%s2307_s4 + $0x1f8] sm:$0xff]  ;;  %v1157_v27 = vld [vmem:[%s2307_s4 + $0x288] sm:$0xff]  ;;  %1688 = vset.pattern.permute.xlu1 %v1689_v50 }
  0x1e   :  { %1526 = vmatpush3.bf16.msra.mxu0 %v1525_v63  ;;  %v1153_v63 = vld [vmem:[%s2307_s4 + $0x268] sm:$0xff]  ;;  %v1601_v12 = vpack.c.bf16 %v1139_v11, %v1138_v10  ;;  %v1158_v32 = vld [vmem:[%s2307_s4 + $0x290] sm:$0xff]  ;;  %v1160_v33 = vld [vmem:[%s2307_s4 + $0x2a0] sm:$0xff] }
  0x1f   :  { %1528 = vmatprep.subr.bf16.mxu0 %v1527_v0  ;;  %1558 = vmatpush3.bf16.msra.mxu1 %v1555_v62  ;;  %v1152_v62 = vld [vmem:[%s2307_s4 + $0x260] sm:$0xff]  ;;  %v1593_v0 = vpack.c.bf16 %v1135_v61, %v1134_v60  ;;  %v1162_v36 = vld [vmem:[%s2307_s4 + $0x2b0] sm:$0xff]  ;;  %v1163_v37 = vld [vmem:[%s2307_s4 + $0x2b8] sm:$0xff] }
  0x20   :  { %1560 = vmatprep.subr.bf16.mxu1 %v1559_v13  ;;  %v1595_v1 = vpack.c.bf16 %v1153_v63, %v1152_v62  ;;  %v1615_v38 = vpack.c.bf16 %v1163_v37, %v1162_v36  ;;  %v1164_v39 = vld [vmem:[%s2307_s4 + $0x2c0] sm:$0xff]  ;;  %v1167_v42 = vld [vmem:[%s2307_s4 + $0x2d8] sm:$0xff]  ;;  %v1169_v45 = vld [vmem:[%s2307_s4 + $0x2e8] sm:$0xff] }
  0x21   :  { %v1168_v44 = vld [vmem:[%s2307_s4 + $0x2e0] sm:$0xff]  ;;  %v1171_v48 = vld [vmem:[%s2307_s4 + $0x2f8] sm:$0xff]  ;;  %v701_v51 = vld [vmem:[%s2310_s6 + $0x10] sm:$0xff] }
  0x22   :  { %1530 = vmatpush3.bf16.msra.mxu0 %v1529_v3  ;;  %v1137_v3 = vld [vmem:[%s2307_s4 + $0x1e8] sm:$0xff]  ;;  %727 = vperm.xlu0 %1687, %v701_v51   ;;  %v699_v55 = vld [vmem:[%s2310_s6] sm:$0xff]  ;;  %v705_v57 = vld [vmem:[%s2310_s6 + $0x30] sm:$0xff] }
  0x23   :  { %1532 = vmatprep.subr.bf16.mxu0 %v1531_v9  ;;  %1562 = vmatpush3.bf16.msra.mxu1 %v1559_v13  ;;  %v1597_v8 = vpack.c.bf16 %v1137_v3, %v1136_v2  ;;  %v1599_v9 = vpack.c.bf16 %v1155_v7, %v1154_v6  ;;  %v704_v54 = vld [vmem:[%s2310_s6 + $0x28] sm:$0xff]  ;;  %v709_v61 = vld [vmem:[%s2310_s6 + $0x50] sm:$0xff]  ;;  %v710_v62 = vld [vmem:[%s2310_s6 + $0x58] sm:$0xff] }
  0x24   :  { %1564 = vmatprep.subr.bf16.mxu1 %v1563_v18  ;;  %v700_v56 = vld [vmem:[%s2310_s6 + $0x8] sm:$0xff]  ;;  %v711_v63 = vld [vmem:[%s2310_s6 + $0x60] sm:$0xff]  ;;  %v714_v2 = vld [vmem:[%s2310_s6 + $0x78] sm:$0xff] }
  0x25   :  { %v708_v60 = vld [vmem:[%s2310_s6 + $0x48] sm:$0xff]  ;;  %v867_v3 = vld [vmem:[%s2311_s7] sm:$0xff]  ;;  %v1021_v37 = vld [vmem:[%s2313_s10 + $0x10] sm:$0xff] }
  0x26   :  { %1534 = vmatpush3.bf16.msra.mxu0 %v1533_v15  ;;  %v895_v10 = vld [vmem:[%s2312_s8] sm:$0xff]  ;;  %v896_v11 = vld [vmem:[%s2312_s8 + $0x8] sm:$0xff]  ;;  %v1030_v50 = vld [vmem:[%s2313_s10 + $0x58] sm:$0xff] }
  0x27   :  { %1566 = vmatpush3.bf16.msra.mxu1 %v1563_v18  ;;  %1572 = vmatprep.subr.bf16.mxu0 %v1571_v30  ;;  %v1020_v36 = vld [vmem:[%s2313_s10 + $0x8] sm:$0xff] }
  0x2a   :  { %1381 = vmatmul.mubr.f32.vlgmr.msra.gmra.mrb[2].mxu1 %v1770_v4 }
  0x2b   :  { %1387 = vmatprep.mubr.msk.f32.mxu1 %vm45_vm0, %v1775_v5 }
  0xdc   :  { %v1340_v20 = vpop.f32.mrb[0].mxu0 }
  0xdd   :  { %v118_v22 = vpop.f32.mrb[1].mxu0  ;;  %v1347_v23 = vpop.f32.mrb[0].mxu1  ;;  %v1944_v26 = vsub.f32 %v1340_v20, %v128_v21 }
  0xde   :  { %v129_v24 = vsub.f32 %v118_v22, %v127_v19  ;;  %v199_v25 = vpop.f32.mrb[1].mxu1 }
  0xe0   :  { %327 = vmatprep.mubr.f32.mxu0 %v129_v24 }
  0xe1   :  { %328 = vmatmul.mubr.f32.vlgmr.msra.gmra.mrb[2].mxu0 %v199_v25  ;;  %v1156_v25 = vld [vmem:[%s2307_s4 + $0x280] sm:$0xff] }
  0xe2   :  { %332 = vmatprep.mubr.f32.mxu0 %v1944_v26  ;;  %1574 = vmatpush3.bf16.msra.mxu0 %v1573_v34  ;;  %v1603_v31 = vpack.c.bf16 %v1157_v27, %v1156_v25  ;;  %v1161_v34 = vld [vmem:[%s2307_s4 + $0x2a8] sm:$0xff] }
  0xe3   :  { %1576 = vmatprep.subr.bf16.mxu0 %v1575_v35  ;;  %v1611_v35 = vpack.c.bf16 %v1161_v34, %v1160_v33  ;;  %v904_v25 = vld [vmem:[%s2312_s8 + $0x48] sm:$0xff]  ;;  %v910_v33 = vld [vmem:[%s2312_s8 + $0x78] sm:$0xff] }
  0xe5   :  { %333 = vmatmul.mubr.f32.gmra.mrb[4].mxu0 %v1347_v23 }
  0xe6   :  { %611 = vmatprep.mubr.f32.mxu0 %v129_v24  ;;  %1578 = vmatpush3.bf16.msra.mxu0 %v1577_v40 }
  0xe7   :  { %1580 = vmatprep.subr.bf16.mxu0 %v1579_v41  ;;  %v1166_v41 = vld [vmem:[%s2307_s4 + $0x2d0] sm:$0xff] }
  0xe8   :  { %v1623_v43 = vpack.c.bf16 %v1167_v42, %v1166_v41  ;;  %v1024_v41 = vld [vmem:[%s2313_s10 + $0x28] sm:$0xff] }
  0xea   :  { %1582 = vmatpush3.bf16.msra.mxu0 %v1581_v46  ;;  %v1627_v46 = vpack.c.bf16 %v1169_v45, %v1168_v44  ;;  %v1026_v44 = vld [vmem:[%s2313_s10 + $0x38] sm:$0xff] }
  0xeb   :  { %1584 = vmatprep.subr.bf16.mxu0 %v1583_v47  ;;  %v1170_v47 = vld [vmem:[%s2307_s4 + $0x2f0] sm:$0xff] }
  0xec   :  { %v1631_v49 = vpack.c.bf16 %v1171_v48, %v1170_v47  ;;  %v1028_v47 = vld [vmem:[%s2313_s10 + $0x48] sm:$0xff] }
  0xee   :  { %1586 = vmatpush3.bf16.msra.mxu0 %v1585_v52  ;;  %v703_v52 = vld [vmem:[%s2310_s6 + $0x20] sm:$0xff] }
  0xef   :  { %1588 = vmatprep.subr.bf16.mxu0 %v1587_v53  ;;  %737 = vperm.xlu1 %1688, %v703_v52   ;;  %v702_v53 = vld [vmem:[%s2310_s6 + $0x18] sm:$0xff]  ;;  %v1031_v52 = vld [vmem:[%s2313_s10 + $0x60] sm:$0xff] }
  0xf0   :  { %732 = vperm.xlu0 %1687, %v702_v53   ;;  %v1032_v53 = vld [vmem:[%s2313_s10 + $0x68] sm:$0xff] }
  0xf2   :  { %1590 = vmatpush3.bf16.msra.mxu0 %v1589_v58  ;;  %v706_v58 = vld [vmem:[%s2310_s6 + $0x38] sm:$0xff] }
  0xf3   :  { %1592 = vmatprep.subr.bf16.mxu0 %v1591_v59  ;;  %742 = vperm.xlu1 %1688, %v704_v54   ;;  %v707_v59 = vld [vmem:[%s2310_s6 + $0x40] sm:$0xff]  ;;  %v1678_v54 = vpack.c.bf16 %v1032_v53, %v1031_v52 }
  0xf4   :  { %717 = vperm.xlu0 %1687, %v699_v55   ;;  %v728_v55 = vpop.permute.xlu0 %727 }
  0xf6   :  { %1594 = vmatpush3.bf16.msra.mxu0 %v1593_v0  ;;  %v712_v0 = vld [vmem:[%s2310_s6 + $0x68] sm:$0xff] }
  0xf7   :  { %1596 = vmatprep.subr.bf16.mxu0 %v1595_v1  ;;  %722 = vperm.xlu1 %1688, %v700_v56   ;;  %v713_v1 = vld [vmem:[%s2310_s6 + $0x70] sm:$0xff] }
  0xf8   :  { %747 = vperm.xlu0 %1687, %v705_v57  }
  0xfa   :  { %1598 = vmatpush3.bf16.msra.mxu0 %v1597_v8 }
  0xfb   :  { %1600 = vmatprep.subr.bf16.mxu0 %v1599_v9  ;;  %752 = vperm.xlu1 %1688, %v706_v58  }
  0xfc   :  { %757 = vperm.xlu0 %1687, %v707_v59  }
  0xfd   :  { %v1947_v4 = vpop.f32.mrb[2].mxu1 }
  0xfe   :  { %v1949_v5 = vpop.f32.mrb[3].mxu1  ;;  %1602 = vmatpush3.bf16.msra.mxu0 %v1601_v12  ;;  %v1636_v12 = vpack.c.bf16 %v896_v11, %v895_v10 }
  0xff   :  { %762 = vperm.xlu1 %1688, %v708_v60  }
 0x100   :  { %767 = vperm.xlu0 %1687, %v709_v61  }
 0x103   :  { %772 = vperm.xlu1 %1688, %v710_v62  }
 0x104   :  { %777 = vperm.xlu0 %1687, %v711_v63  }
 0x107   :  { %782 = vperm.xlu1 %1688, %v712_v0  }
 0x108   :  { %787 = vperm.xlu0 %1687, %v713_v1  }
 0x10b   :  { %792 = vperm.xlu1 %1688, %v714_v2  }
 0x10c   :  { %870 = vperm.xlu0 %1687, %v867_v3  }
 0x16e   :  { %v738_v58 = vpop.permute.xlu1 %737 }
 0x16f   :  { %v733_v56 = vpop.permute.xlu0 %732 }
 0x172   :  { %v743_v60 = vpop.permute.xlu1 %742 }
 0x173   :  { %v718_v57 = vpop.permute.xlu0 %717 }
 0x176   :  { %v723_v62 = vpop.permute.xlu1 %722 }
 0x177   :  { %v748_v59 = vpop.permute.xlu0 %747 }
 0x17a   :  { %v753_v0 = vpop.permute.xlu1 %752 }
 0x17b   :  { %v758_v61 = vpop.permute.xlu0 %757 }
 0x17e   :  { %v763_v2 = vpop.permute.xlu1 %762 }
 0x17f   :  { %v768_v63 = vpop.permute.xlu0 %767 }
 0x182   :  { %v773_v11 = vpop.permute.xlu1 %772 }
 0x183   :  { %v778_v1 = vpop.permute.xlu0 %777 }
 0x1b4   :  { %v1216_v13 = vpop.f32.mrb[2].mxu0 }
 0x1b5   :  { %v1217_v15 = vpop.f32.mrb[3].mxu0 }
 0x1b6   :  { %v1218_v17 = vadd.f32 %v1217_v15, %v1216_v13  ;;  %v1690_v13 = vmov 0.0|0.0   ;;  %v898_v15 = vld [vmem:[%s2312_s8 + $0x18] sm:$0xff] }
 0x1b7   :  { %1635 = vmatprep.subr.bf16.mxu0 %v1690_v13 }
 0x1b8   :  { %v1219_v18 = vpop.f32.mrb[4].mxu0  ;;  %v330_v19 = vadd.f32 %v1218_v17, %v1121_v16  ;;  %v899_v17 = vld [vmem:[%s2312_s8 + $0x20] sm:$0xff] }
 0x1b9   :  { %v1220_v20 = vpop.f32.mrb[5].mxu0 }
 0x1ba   :  { %v1221_v21 = vadd.f32 %v1220_v20, %v1219_v18  ;;  %v405_v22 = vadd.f32 %v1949_v5, %v330_v19  ;;  %v900_v18 = vld [vmem:[%s2312_s8 + $0x28] sm:$0xff]  ;;  %v1692_v19 = vmov 0.0  }
 0x1bb   :  { %v1642_v20 = vpack.c.bf16 %v900_v18, %v899_v17 }
 0x1bc   :  { %v335_v23 = vadd.f32 %v1221_v21, %v1121_v16  ;;  %v413_v28 = vmax.f32 %v405_v22, 0.0  ;;  %v901_v21 = vld [vmem:[%s2312_s8 + $0x30] sm:$0xff]  ;;  %v902_v22 = vld [vmem:[%s2312_s8 + $0x38] sm:$0xff] }
 0x1be   :  { %v410_v24 = vadd.f32 %v1947_v4, %v335_v23  ;;  %v1159_v4 = vld [vmem:[%s2307_s4 + $0x298] sm:$0xff]  ;;  %v1645_v23 = vpack.c.bf16 %v902_v22, %v901_v21 }
 0x1bf   :  { %v1607_v5 = vpack.c.bf16 %v1159_v4, %v1158_v32  ;;  %v908_v32 = vld [vmem:[%s2312_s8 + $0x68] sm:$0xff] }
 0x1c0   :  { %v414_v29 = vmax.f32 %v410_v24, 0.0  ;;  %v903_v24 = vld [vmem:[%s2312_s8 + $0x40] sm:$0xff] }
 0x1c1   :  { %v1648_v27 = vpack.c.bf16 %v904_v25, %v903_v24 }
 0x1c2   :  { %v1567_v30 = vpack.c.bf16 %v414_v29, %v413_v28 }
 0x1c4   :  { %1568 = vmatprep.subr.bf16.mxu1 %v1567_v30 }
 0x1c5   :  { %1570 = vmatpush3.bf16.msra.mxu1 %v1567_v30 }
 0x1c6   :  { %1604 = vmatprep.subr.bf16.mxu1 %v1603_v31 }
 0x1c8   :  { %1388 = vmatmul.mubr.msk.f32.vlgmr.msra.gmra.mrb[4].mxu1 %vm45_vm0, %v1803_v14  ;;  %v1165_v14 = vld [vmem:[%s2307_s4 + $0x2c8] sm:$0xff] }
 0x1c9   :  { %1606 = vmatpush3.bf16.msra.mxu1 %v1603_v31  ;;  %1422 = vmatprep.mubr.f32.mxu1 %v413_v28  ;;  %v1619_v40 = vpack.c.bf16 %v1165_v14, %v1164_v39  ;;  %v905_v28 = vld [vmem:[%s2312_s8 + $0x50] sm:$0xff]  ;;  %v907_v31 = vld [vmem:[%s2312_s8 + $0x60] sm:$0xff]  ;;  %v1022_v39 = vld [vmem:[%s2313_s10 + $0x18] sm:$0xff] }
 0x1ca   :  { %1608 = vmatprep.subr.bf16.mxu1 %v1607_v5  ;;  %v1654_v4 = vpack.c.bf16 %v908_v32, %v907_v31  ;;  %v1663_v14 = vpack.c.bf16 %v1022_v39, %v1021_v37 }
 0x1cd   :  { %1610 = vmatpush3.bf16.msra.mxu1 %v1607_v5  ;;  %v909_v5 = vld [vmem:[%s2312_s8 + $0x70] sm:$0xff] }
 0x1ce   :  { %1612 = vmatprep.subr.bf16.mxu1 %v1611_v35  ;;  %v1657_v34 = vpack.c.bf16 %v910_v33, %v909_v5 }
 0x1d1   :  { %1614 = vmatpush3.bf16.msra.mxu1 %v1611_v35  ;;  %v1019_v35 = vld [vmem:[%s2313_s10] sm:$0xff] }
 0x1d2   :  { %1616 = vmatprep.subr.bf16.mxu1 %v1615_v38 }
 0x1d5   :  { %1618 = vmatpush3.bf16.msra.mxu1 %v1615_v38  ;;  %v1660_v38 = vpack.c.bf16 %v1020_v36, %v1019_v35 }
 0x1d6   :  { %1620 = vmatprep.subr.bf16.mxu1 %v1619_v40 }
 0x1d9   :  { %1622 = vmatpush3.bf16.msra.mxu1 %v1619_v40  ;;  %v1023_v40 = vld [vmem:[%s2313_s10 + $0x20] sm:$0xff] }
 0x1da   :  { %1624 = vmatprep.subr.bf16.mxu1 %v1623_v43  ;;  %v1666_v42 = vpack.c.bf16 %v1024_v41, %v1023_v40 }
 0x1dd   :  { %1626 = vmatpush3.bf16.msra.mxu1 %v1623_v43  ;;  %v1025_v43 = vld [vmem:[%s2313_s10 + $0x30] sm:$0xff] }
 0x1de   :  { %1628 = vmatprep.subr.bf16.mxu1 %v1627_v46  ;;  %v1669_v45 = vpack.c.bf16 %v1026_v44, %v1025_v43 }
 0x1e1   :  { %1630 = vmatpush3.bf16.msra.mxu1 %v1627_v46  ;;  %v1027_v46 = vld [vmem:[%s2313_s10 + $0x40] sm:$0xff] }
 0x1e2   :  { %1632 = vmatprep.subr.bf16.mxu1 %v1631_v49  ;;  %v1672_v48 = vpack.c.bf16 %v1028_v47, %v1027_v46 }
 0x1e5   :  { %1634 = vmatpush3.bf16.msra.mxu1 %v1631_v49  ;;  %v1029_v49 = vld [vmem:[%s2313_s10 + $0x50] sm:$0xff] }
 0x1e6   :  { %1659 = vmatprep.subr.bf16.mxu1 %v1690_v13  ;;  %v1675_v51 = vpack.c.bf16 %v1030_v50, %v1029_v49 }
 0x1e8   :  { %1423 = vmatmul.mubr.f32.vlgmr.msra.gmra.mrb[6].mxu1 %v414_v29  ;;  %v906_v29 = vld [vmem:[%s2312_s8 + $0x58] sm:$0xff] }
 0x1e9   :  { %1492 = vmatprep.mubr.msk.f32.mxu1 %vm1691_vm1, %v1692_v19  ;;  %v1651_v30 = vpack.c.bf16 %v906_v29, %v905_v28  ;;  %1661 = vmatpush3.bf16.msra.mxu1 %v1660_v38 }
 0x1ea   :  { %1662 = vmatprep.subr.bf16.mxu1 %v1690_v13 }
 0x1ed   :  { %1664 = vmatpush3.bf16.msra.mxu1 %v1663_v14 }
 0x1ee   :  { %1665 = vmatprep.subr.bf16.mxu1 %v1690_v13 }
 0x1f1   :  { %1667 = vmatpush3.bf16.msra.mxu1 %v1666_v42 }
 0x1f2   :  { %1668 = vmatprep.subr.bf16.mxu1 %v1690_v13 }
 0x1f5   :  { %1670 = vmatpush3.bf16.msra.mxu1 %v1669_v45 }
 0x1f6   :  { %1671 = vmatprep.subr.bf16.mxu1 %v1690_v13 }
 0x1f9   :  { %1673 = vmatpush3.bf16.msra.mxu1 %v1672_v48 }
 0x1fa   :  { %1674 = vmatprep.subr.bf16.mxu1 %v1690_v13 }
 0x1fd   :  { %1676 = vmatpush3.bf16.msra.mxu1 %v1675_v51 }
 0x1fe   :  { %1677 = vmatprep.subr.bf16.mxu1 %v1690_v13 }
 0x201   :  { %1679 = vmatpush3.bf16.msra.mxu1 %v1678_v54 }
 0x202   :  { %1680 = vmatprep.subr.bf16.mxu1 %v1690_v13 }
 0x29b   :  { %v1389_v6 = vpop.f32.mrb[4].mxu1 }
 0x29c   :  { %v481_v7 = vpop.f32.mrb[5].mxu1 }
 0x29d   :  { %612 = vmatmul.mubr.f32.vlgmr.msra.gmra.mrb[6].mxu0 %v481_v7  ;;  %v1173_v7 = vld [vmem:[%s2309_s5 + $0x1] ss:$0 sm:$0xff] }
 0x29e   :  { %616 = vmatprep.mubr.f32.mxu0 %v1944_v26  ;;  %1637 = vmatpush3.bf16.msra.mxu0 %v1636_v12  ;;  %v897_v26 = vld [vmem:[%s2312_s8 + $0x10] sm:$0xff] }
 0x29f   :  { %1638 = vmatprep.subr.bf16.mxu0 %v1690_v13  ;;  %v1639_v16 = vpack.c.bf16 %v898_v15, %v897_v26 }
 0x2a1   :  { %617 = vmatmul.mubr.f32.gmra.mrb[8].mxu0 %v1389_v6  ;;  %v788_v6 = vpop.permute.xlu0 %787 }
 0x2a2   :  { %1457 = vmatprep.mubr.msk.f32.mxu0 %vm1691_vm1, %v1692_v19  ;;  %1640 = vmatpush3.bf16.msra.mxu0 %v1639_v16  ;;  %v783_v19 = vpop.permute.xlu1 %782 }
 0x2a3   :  { %1641 = vmatprep.subr.bf16.mxu0 %v1690_v13 }
 0x2a5   :  { %v2268_v18 = vpop.permute.xlu0 %870 }
 0x2a6   :  { %1643 = vmatpush3.bf16.msra.mxu0 %v1642_v20  ;;  %v872_v22 = vrot.slane %v2268_v18, 1  ;;  %v874_v25 = vrot.slane %v2268_v18, 3  ;;  %v876_v28 = vrot.slane %v2268_v18, 5  ;;  %v793_v35 = vpop.permute.xlu1 %792 }
 0x2a7   :  { %1644 = vmatprep.subr.bf16.mxu0 %v1690_v13 }
 0x2aa   :  { %1646 = vmatpush3.bf16.msra.mxu0 %v1645_v23  ;;  %v873_v23 = vrot.slane %v2268_v18, 2 }
 0x2ab   :  { %1647 = vmatprep.subr.bf16.mxu0 %v1690_v13 }
 0x2ae   :  { %1649 = vmatpush3.bf16.msra.mxu0 %v1648_v27  ;;  %v875_v27 = vrot.slane %v2268_v18, 4 }
 0x2af   :  { %1650 = vmatprep.subr.bf16.mxu0 %v1690_v13 }
 0x2b2   :  { %1652 = vmatpush3.bf16.msra.mxu0 %v1651_v30 }
 0x2b3   :  { %1653 = vmatprep.subr.bf16.mxu0 %v1690_v13 }
 0x2b6   :  { %1655 = vmatpush3.bf16.msra.mxu0 %v1654_v4 }
 0x2b7   :  { %1656 = vmatprep.subr.bf16.mxu0 %v1690_v13 }
 0x2ba   :  { %1658 = vmatpush3.bf16.msra.mxu0 %v1657_v34 }
 0x2bb   :  { %v2154_v8 = vpop.f32.mrb[6].mxu1 }
 0x2bc   :  { %v2156_v9 = vpop.f32.mrb[7].mxu1 }
 0x370   :  { %v1276_v3 = vpop.f32.mrb[6].mxu0 }
 0x371   :  { %v1277_v10 = vpop.f32.mrb[7].mxu0 }
 0x372   :  { %v1278_v12 = vadd.f32 %v1277_v10, %v1276_v3 }
 0x374   :  { %v614_v13 = vadd.f32 %v1278_v12, %v1173_v7  ;;  %v1279_v26 = vpop.f32.mrb[8].mxu0 }
 0x375   :  { %v1280_v15 = vpop.f32.mrb[9].mxu0 }
 0x376   :  { %v689_v16 = vadd.f32 %v2156_v9, %v614_v13  ;;  %v1281_v17 = vadd.f32 %v1280_v15, %v1279_v26 }
 0x378   :  { %v697_v20 = vmax.f32 %v689_v16, 0.0  ;;  %v619_v21 = vadd.f32 %v1281_v17, %v1173_v7 }
 0x37a   :  { %v694_v24 = vadd.f32 %v2154_v8, %v619_v21  ;;  %v795_v29 = vadd.f32 %v718_v57, %v697_v20  ;;  %v797_v30 = vadd.f32 %v728_v55, %v697_v20  ;;  %v799_v31 = vadd.f32 %v738_v58, %v697_v20 }
 0x37b   :  { %v801_v32 = vadd.f32 %v748_v59, %v697_v20  ;;  %v803_v4 = vadd.f32 %v758_v61, %v697_v20  ;;  %v805_v5 = vadd.f32 %v768_v63, %v697_v20  ;;  %v807_v33 = vadd.f32 %v778_v1, %v697_v20 }
 0x37c   :  { %v698_v9 = vmax.f32 %v694_v24, 0.0  ;;  %v809_v34 = vadd.f32 %v788_v6, %v697_v20 }
 0x37e   :  { %v796_v36 = vadd.f32 %v723_v62, %v698_v9  ;;  %v798_v37 = vadd.f32 %v733_v56, %v698_v9  ;;  %v800_v38 = vadd.f32 %v743_v60, %v698_v9  ;;  %v802_v8 = vadd.f32 %v753_v0, %v698_v9 }
 0x37f   :  { %v804_v39 = vadd.f32 %v763_v2, %v698_v9  ;;  %v806_v14 = vadd.f32 %v773_v11, %v698_v9  ;;  %v808_v40 = vadd.f32 %v783_v19, %v698_v9  ;;  %v810_v41 = vadd.f32 %v793_v35, %v698_v9 }
 0x380   :  { %v811_v42 = vmax.f32 %v795_v29, %v796_v36  ;;  %v818_v43 = vmax.f32 %v797_v30, %v798_v37  ;;  %v825_v44 = vmax.f32 %v799_v31, %v800_v38  ;;  %v832_v45 = vmax.f32 %v801_v32, %v802_v8 }
 0x381   :  { %v839_v46 = vmax.f32 %v803_v4, %v804_v39  ;;  %v846_v47 = vmax.f32 %v805_v5, %v806_v14  ;;  %v853_v48 = vmax.f32 %v807_v33, %v808_v40  ;;  %v860_v49 = vmax.f32 %v809_v34, %v810_v41 }
 0x382   :  { %v812_v50 = vrot.slane %v811_v42, 4  ;;  %v819_v51 = vrot.slane %v818_v43, 4  ;;  %v826_v52 = vrot.slane %v825_v44, 4  ;;  %v833_v53 = vrot.slane %v832_v45, 4 }
 0x383   :  { %v840_v54 = vrot.slane %v839_v46, 4  ;;  %v847_v55 = vrot.slane %v846_v47, 4  ;;  %v854_v56 = vrot.slane %v853_v48, 4  ;;  %v861_v57 = vrot.slane %v860_v49, 4 }
 0x384   :  { %v813_v58 = vmax.f32 %v811_v42, %v812_v50  ;;  %v820_v59 = vmax.f32 %v818_v43, %v819_v51  ;;  %v827_v60 = vmax.f32 %v825_v44, %v826_v52  ;;  %v834_v61 = vmax.f32 %v832_v45, %v833_v53 }
 0x385   :  { %v841_v62 = vmax.f32 %v839_v46, %v840_v54  ;;  %v848_v63 = vmax.f32 %v846_v47, %v847_v55  ;;  %v855_v0 = vmax.f32 %v853_v48, %v854_v56  ;;  %v862_v1 = vmax.f32 %v860_v49, %v861_v57 }
 0x386   :  { %v814_v2 = vrot.slane %v813_v58, 2  ;;  %v821_v3 = vrot.slane %v820_v59, 2  ;;  %v828_v6 = vrot.slane %v827_v60, 2  ;;  %v835_v7 = vrot.slane %v834_v61, 2 }
 0x387   :  { %v842_v10 = vrot.slane %v841_v62, 2  ;;  %v849_v11 = vrot.slane %v848_v63, 2  ;;  %v856_v12 = vrot.slane %v855_v0, 2  ;;  %v863_v13 = vrot.slane %v862_v1, 2 }
 0x388   :  { %v815_v26 = vmax.f32 %v813_v58, %v814_v2  ;;  %v822_v15 = vmax.f32 %v820_v59, %v821_v3  ;;  %v829_v16 = vmax.f32 %v827_v60, %v828_v6  ;;  %v836_v17 = vmax.f32 %v834_v61, %v835_v7  ;;  %v1033_v58 = vld [vmem:[%s2313_s10 + $0x70] sm:$0xff]  ;;  %v1034_v59 = vld [vmem:[%s2313_s10 + $0x78] sm:$0xff]  ;;  %v1174_v61 = vld [vmem:[%s2314_s9] ss:$0 sm:$0xff] }
 0x389   :  { %v843_v19 = vmax.f32 %v841_v62, %v842_v10  ;;  %v850_v20 = vmax.f32 %v848_v63, %v849_v11  ;;  %v857_v21 = vmax.f32 %v855_v0, %v856_v12  ;;  %v864_v24 = vmax.f32 %v862_v1, %v863_v13  ;;  %v1175_v2 = vld [vmem:[%s2315_s11] ss:$0 sm:$0xff] }
 0x38a   :  { %v816_v29 = vrot.slane %v815_v26, 1  ;;  %v823_v9 = vrot.slane %v822_v15, 1  ;;  %v830_v30 = vrot.slane %v829_v16, 1  ;;  %v837_v31 = vrot.slane %v836_v17, 1 }
 0x38b   :  { %v844_v32 = vrot.slane %v843_v19, 1  ;;  %v851_v4 = vrot.slane %v850_v20, 1  ;;  %v858_v5 = vrot.slane %v857_v21, 1  ;;  %v865_v33 = vrot.slane %v864_v24, 1 }
 0x38c   :  { %v817_v34 = vmax.f32 %v815_v26, %v816_v29  ;;  %v824_v35 = vmax.f32 %v822_v15, %v823_v9  ;;  %v831_v36 = vmax.f32 %v829_v16, %v830_v30  ;;  %v838_v37 = vmax.f32 %v836_v17, %v837_v31 }
 0x38d   :  { %v845_v38 = vmax.f32 %v843_v19, %v844_v32  ;;  %v852_v8 = vmax.f32 %v850_v20, %v851_v4  ;;  %v859_v39 = vmax.f32 %v857_v21, %v858_v5  ;;  %v877_v14 = vrot.slane %v2268_v18, 6 }
 0x38e   :  { %v866_v40 = vmax.f32 %v864_v24, %v865_v33  ;;  %v888_v41 = vmul.f32 %v872_v22, %v824_v35  ;;  %v889_v42 = vmul.f32 %v873_v23, %v831_v36  ;;  %v890_v43 = vmul.f32 %v874_v25, %v838_v37 }
 0x38f   :  { %v878_v44 = vrot.slane %v2268_v18, 7  ;;  %v891_v45 = vmul.f32 %v875_v27, %v845_v38  ;;  %v887_v46 = vmul.f32 %v2268_v18, %v817_v34  ;;  %v892_v47 = vmul.f32 %v876_v28, %v852_v8 }
 0x390   :  { %v926_v48 = vrot.slane %v888_v41, 7  ;;  %v929_v22 = vrot.slane %v889_v42, 6  ;;  %v893_v49 = vmul.f32 %v877_v14, %v859_v39  ;;  %v932_v51 = vrot.slane %v890_v43, 5 }
 0x391   :  { %v894_v23 = vmul.f32 %v878_v44, %v866_v40  ;;  %v935_v52 = vrot.slane %v891_v45, 4  ;;  %v938_v27 = vrot.slane %v892_v47, 3  ;;  %v1681_v60 = vpack.c.bf16 %v1034_v59, %v1033_v58 }
 0x392   :  { %v928_v50 = vsel %vm927_vm2, %v926_v48, %v887_v46  ;;  %v941_v55 = vrot.slane %v893_v49, 2 }
 0x393   :  { %v931_v25 = vsel %vm930_vm3, %v929_v22, %v928_v50  ;;  %v944_v18 = vrot.slane %v894_v23, 1  ;;  %1682 = vmatpush3.bf16.msra.mxu1 %v1681_v60 }
 0x394   :  { %v934_v53 = vsel %vm933_vm4, %v932_v51, %v931_v25 }
 0x395   :  { %v937_v54 = vsel %vm936_vm5, %v935_v52, %v934_v53 }
 0x396   :  { %v940_v56 = vsel %vm939_vm6, %v938_v27, %v937_v54 }
 0x397   :  { %v943_v28 = vsel %vm942_vm7, %v941_v55, %v940_v56 }
 0x398   :  { %v946_v57 = vsel %vm945_vm8, %v944_v18, %v943_v28 }
 0x399   :  { %1458 = vmatmul.mubr.f32.vlgmr.msra.gmra.mrb[10].mxu0 %v946_v57 }
 0x46c   :  { %v1014_v62 = vpop.f32.mrb[10].mxu0 }
 0x46d   :  { %v1015_v63 = vadd.f32 %v1174_v61, %v1014_v62  ;;  %v1459_v0 = vpop.f32.mrb[11].mxu0 }
 0x46f   :  { %v1018_v1 = vmax.f32 %v1015_v63, 0.0 }
 0x471   :  { %1493 = vmatmul.mubr.f32.vlgmr.msra.gmra.mrb[8].mxu1 %v1018_v1 }
 0x544   :  { %v1108_v3 = vpop.f32.mrb[8].mxu1 }
 0x545   :  { %v1109_v6 = vadd.f32 %v1175_v2, %v1108_v3  ;;  %v1494_v7 = vpop.f32.mrb[9].mxu1 }
 0x547   :  { %1112 = vst [vmem:[%s2316_s12] sm:$0xff] %v1109_v6 }

</bundles_post_ra>
